<compile_context>
chip_gen: v7x
topology: tpu7x:2x2x1
jax: 0.10.0
libtpu: 0.0.40
codegen_flags: <defaults>
</compile_context>

<pallas_src>
import functools

import jax
import jax.numpy as jnp
from jax.experimental import pallas as pl
from jax.experimental.pallas import tpu as pltpu

LN_EPS = 1e-5                    # torch.nn.LayerNorm default
NEG_INF = -1e30                  # finite mask value (padding-safe, no NaN)
VMEM_LIMIT = 32 * 1024 * 1024    # explicit scoped-VMEM budget (safe on all gens)


# ----------------------------------------------------------------------------
# Shared math helpers (traced inside kernels)
# ----------------------------------------------------------------------------
def _layernorm(x, g, b):
    mu = jnp.mean(x, axis=-1, keepdims=True)
    var = jnp.mean((x - mu) ** 2, axis=-1, keepdims=True)
    return (x - mu) * jax.lax.rsqrt(var + LN_EPS) * g + b


def _gelu_exact(x):
    # torch.nn.GELU default = exact erf formulation
    return 0.5 * x * (1.0 + jax.lax.erf(x * (2.0 ** -0.5)))


# ----------------------------------------------------------------------------
# Kernels
# ----------------------------------------------------------------------------
def _attn_block_kernel(x_ref, g_ref, beta_ref, wqkv_ref, wout_ref, bout_ref,
                       o_ref, *, heads, dim_head, scale):
    """Fused: LN -> qkv -> causal SDPA (all heads) -> out-proj + residual."""
    x = x_ref[0].astype(jnp.float32)                   # (N, D)
    n, d = x.shape
    inner = heads * dim_head

    xn = _layernorm(x, g_ref[...], beta_ref[...])
    # bf16 operands, f32 accumulation on the MXU.
    qkv = jnp.dot(xn.astype(jnp.bfloat16), wqkv_ref[...],
                  preferred_element_type=jnp.float32)  # (N, 3*inner)

    # Causal mask built once per kernel body; finite negative is robust to
    # any future padding of N (no exp(-inf) NaN rows).
    row = jax.lax.broadcasted_iota(jnp.int32, (n, n), 0)
    col = jax.lax.broadcasted_iota(jnp.int32, (n, n), 1)
    causal = col <= row

    acc = jnp.zeros((n, d), jnp.float32)
    for h in range(heads):                             # static unroll
        lo = h * dim_head
        q = qkv[:, lo:lo + dim_head]
        k = qkv[:, inner + lo:inner + lo + dim_head]
        v = qkv[:, 2 * inner + lo:2 * inner + lo + dim_head]

        s = jnp.einsum("nd,md->nm",
                       q.astype(jnp.bfloat16), k.astype(jnp.bfloat16),
                       preferred_element_type=jnp.float32) * scale
        s = jnp.where(causal, s, NEG_INF)
        m = jnp.max(s, axis=-1, keepdims=True)
        p = jnp.exp(s - m)
        denom = jnp.sum(p, axis=-1, keepdims=True)
        o = jnp.dot(p.astype(jnp.bfloat16), v.astype(jnp.bfloat16),
                    preferred_element_type=jnp.float32)
        o = o * pl.reciprocal(denom, approx=True)      # EUP, frees VALU slots

        # Fold the head straight into the output projection:
        #   attn @ W_out == sum_h (o_h @ W_out[h*dh:(h+1)*dh, :])
        w_h = wout_ref[lo:lo + dim_head, :]            # (dim_head, D) bf16
        acc = acc + jnp.dot(o.astype(jnp.bfloat16), w_h,
                            preferred_element_type=jnp.float32)

    o_ref[0] = (acc + bout_ref[...] + x).astype(o_ref.dtype)


def _ff_block_kernel(x_ref, g_ref, beta_ref, w1_ref, b1_ref, w2_ref, b2_ref,
                     o_ref):
    """Fused: LN -> W_ff1 -> GELU -> W_ff2 + bias + residual (one M-tile)."""
    x = x_ref[...].astype(jnp.float32)                 # (tm, D)
    xn = _layernorm(x, g_ref[...], beta_ref[...])
    h = jnp.dot(xn.astype(jnp.bfloat16), w1_ref[...],
                preferred_element_type=jnp.float32) + b1_ref[...]
    h = _gelu_exact(h)                                 # stays on-chip
    y = jnp.dot(h.astype(jnp.bfloat16), w2_ref[...],
                preferred_element_type=jnp.float32) + b2_ref[...]
    o_ref[...] = (y + x).astype(o_ref.dtype)


def _ln_kernel(x_ref, g_ref, beta_ref, o_ref):
    x = x_ref[...].astype(jnp.float32)
    o_ref[...] = _layernorm(x, g_ref[...], beta_ref[...]).astype(o_ref.dtype)


# ----------------------------------------------------------------------------
# pallas_call wrappers
# ----------------------------------------------------------------------------
def _compiler_params():
    return pltpu.CompilerParams(
        dimension_semantics=("parallel",),
        vmem_limit_bytes=VMEM_LIMIT)


def _tile_m(m, cap):
    """Largest token-tile <= cap that divides M and respects the (8,·) rule."""
    if m <= cap or m % 8 != 0:
        return m
    tm = cap - (cap % 8)
    while m % tm:
        tm -= 8
    return tm


def attention_block(x, g, b, w_qkv, w_out, b_out, *, heads, dim_head):
    B, N, D = x.shape
    inner = heads * dim_head
    scale = float(dim_head) ** -0.5
    kern = functools.partial(_attn_block_kernel, heads=heads,
                             dim_head=dim_head, scale=scale)

    def const(shape):
        return pl.BlockSpec(shape, lambda i: (0, 0))   # resident across grid

    return pl.pallas_call(
        kern,
        out_shape=jax.ShapeDtypeStruct((B, N, D), x.dtype),
        grid=(B,),
        in_specs=[
            pl.BlockSpec((1, N, D), lambda i: (i, 0, 0)),
            const((1, D)), const((1, D)),
            const((D, 3 * inner)),
            const((inner, D)),
            const((1, D)),
        ],
        out_specs=pl.BlockSpec((1, N, D), lambda i: (i, 0, 0)),
        compiler_params=_compiler_params(),
    )(x, g, b, w_qkv, w_out, b_out)


def feedforward_block(x2d, g, b, w1, b1, w2, b2, *, tm_cap=256):
    M, D = x2d.shape
    H = w1.shape[1]
    tm = _tile_m(M, tm_cap)

    def const(shape):
        return pl.BlockSpec(shape, lambda i: (0, 0))

    return pl.pallas_call(
        _ff_block_kernel,
        out_shape=jax.ShapeDtypeStruct((M, D), x2d.dtype),
        grid=(M // tm,),
        in_specs=[
            pl.BlockSpec((tm, D), lambda i: (i, 0)),
            const((1, D)), const((1, D)),
            const((D, H)), const((1, H)),
            const((H, D)), const((1, D)),
        ],
        out_specs=pl.BlockSpec((tm, D), lambda i: (i, 0)),
        compiler_params=_compiler_params(),
    )(x2d, g, b, w1, b1, w2, b2)


def layer_norm(x2d, g, b, *, tm_cap=512):
    M, D = x2d.shape
    tm = _tile_m(M, tm_cap)

    def const(shape):
        return pl.BlockSpec(shape, lambda i: (0, 0))

    return pl.pallas_call(
        _ln_kernel,
        out_shape=jax.ShapeDtypeStruct((M, D), x2d.dtype),
        grid=(M // tm,),
        in_specs=[pl.BlockSpec((tm, D), lambda i: (i, 0)),
                  const((1, D)), const((1, D))],
        out_specs=pl.BlockSpec((tm, D), lambda i: (i, 0)),
        compiler_params=_compiler_params(),
    )(x2d, g, b)


# ----------------------------------------------------------------------------
# Parameters (deterministic, synthetic) + forward passes
# ----------------------------------------------------------------------------
def init_params(key, num_patches, num_frames, dim, depth, heads, dim_head, mlp_dim):
    inner = heads * dim_head
    keys = jax.random.split(key, 1 + depth * 4)
    params = {
        "pos": jax.random.normal(keys[0], (1, num_frames * num_patches, dim),
                                 jnp.float32),
        "final_ln_g": jnp.ones((1, dim), jnp.float32),
        "final_ln_b": jnp.zeros((1, dim), jnp.float32),
        "layers": [],
    }
    w = 0.02
    for i in range(depth):
        k0, k1, k2, k3 = keys[1 + 4 * i: 5 + 4 * i]
        layer = {
            "attn_ln_g": jnp.ones((1, dim), jnp.float32),
            "attn_ln_b": jnp.zeros((1, dim), jnp.float32),
            "w_qkv": w * jax.random.normal(k0, (dim, 3 * inner), jnp.float32),
            "w_out": w * jax.random.normal(k1, (inner, dim), jnp.float32),
            "b_out": jnp.zeros((1, dim), jnp.float32),
            "ff_ln_g": jnp.ones((1, dim), jnp.float32),
            "ff_ln_b": jnp.zeros((1, dim), jnp.float32),
            "w_ff1": w * jax.random.normal(k2, (dim, mlp_dim), jnp.float32),
            "b_ff1": jnp.zeros((1, mlp_dim), jnp.float32),
            "w_ff2": w * jax.random.normal(k3, (mlp_dim, dim), jnp.float32),
            "b_ff2": jnp.zeros((1, dim), jnp.float32),
        }
        params["layers"].append(layer)
    return params


def pallas_forward(x, params, heads, dim_head):
    B, N, D = x.shape

    # Positional-embedding add: single elementwise op, fused for free by XLA.
    x = x + params["pos"][:, :N]

    for lyr in params["layers"]:
        # Fused attention block (LN -> qkv -> causal SDPA -> proj + residual).
        x = attention_block(
            x, lyr["attn_ln_g"], lyr["attn_ln_b"],
            lyr["w_qkv"].astype(jnp.bfloat16),
            lyr["w_out"].astype(jnp.bfloat16),
            lyr["b_out"], heads=heads, dim_head=dim_head)

        # Fused feed-forward block (LN -> W1 -> GELU -> W2 + residual).
        x2d = feedforward_block(
            x.reshape(B * N, D), lyr["ff_ln_g"], lyr["ff_ln_b"],
            lyr["w_ff1"].astype(jnp.bfloat16), lyr["b_ff1"],
            lyr["w_ff2"].astype(jnp.bfloat16), lyr["b_ff2"])
        x = x2d.reshape(B, N, D)

    out = layer_norm(x.reshape(B * N, D),
                     params["final_ln_g"], params["final_ln_b"])
    return out.reshape(B, N, D)


def reference_forward(x, params, heads, dim_head):
    """Pure-JAX (f32) reference mirroring the PyTorch module (eval mode)."""
    def ln(t, g, b):
        mu = jnp.mean(t, -1, keepdims=True)
        var = jnp.mean((t - mu) ** 2, -1, keepdims=True)
        return (t - mu) * jax.lax.rsqrt(var + LN_EPS) * g + b

    B, N, D = x.shape
    inner = heads * dim_head
    scale = float(dim_head) ** -0.5
    x = x + params["pos"][:, :N]
    for lyr in params["layers"]:
        xn = ln(x, lyr["attn_ln_g"], lyr["attn_ln_b"])
        qkv = xn @ lyr["w_qkv"]
        q, k, v = (qkv[..., :inner], qkv[..., inner:2 * inner], qkv[..., 2 * inner:])

        def split(t):
            return t.reshape(B, N, heads, dim_head).transpose(0, 2, 1, 3)

        q, k, v = split(q), split(k), split(v)
        s = jnp.einsum("bhnd,bhmd->bhnm", q, k) * scale
        mask = jnp.tril(jnp.ones((N, N), bool))
        s = jnp.where(mask, s, -jnp.inf)
        p = jax.nn.softmax(s, axis=-1)
        o = jnp.einsum("bhnm,bhmd->bhnd", p, v)
        o = o.transpose(0, 2, 1, 3).reshape(B, N, inner)
        x = o @ lyr["w_out"] + lyr["b_out"] + x

        xn = ln(x, lyr["ff_ln_g"], lyr["ff_ln_b"])
        h = _gelu_exact(xn @ lyr["w_ff1"] + lyr["b_ff1"])
        x = h @ lyr["w_ff2"] + lyr["b_ff2"] + x
    return ln(x, params["final_ln_g"], params["final_ln_b"])


# ----------------------------------------------------------------------------
if __name__ == "__main__":
    # Small shapes consistent with the module's forward.
    B = 2
    num_patches = 4
    num_frames = 2
    N = num_patches * num_frames      # sequence length = 8
    dim = 64
    depth = 2
    heads = 4
    dim_head = 16
    mlp_dim = 128

    root = jax.random.PRNGKey(0)
    k_x, k_p = jax.random.split(root)
    x = jax.random.normal(k_x, (B, N, dim), jnp.float32)
    params = init_params(k_p, num_patches, num_frames, dim, depth,
                         heads, dim_head, mlp_dim)

    out = pallas_forward(x, params, heads, dim_head)
    out = jax.block_until_ready(out)

    ref = reference_forward(x, params, heads, dim_head)
    assert out.shape == (B, N, dim)
    assert bool(jnp.all(jnp.isfinite(out)))
    max_err = float(jnp.max(jnp.abs(out - ref)))
    assert max_err < 3e-2, f"mismatch vs reference: {max_err}"

    print("KERNEL_OK")
</pallas_src>

<mosaic_0001>
module attributes {stable_mosaic.version = 11 : i64} {
  func.func @_attn_block_kernel(%arg0: i32, %arg1: memref<1x8x64xf32, #tpu.memory_space<vmem>>, %arg2: memref<1x64xf32, #tpu.memory_space<vmem>>, %arg3: memref<1x64xf32, #tpu.memory_space<vmem>>, %arg4: memref<64x192xbf16, #tpu.memory_space<vmem>>, %arg5: memref<64x64xbf16, #tpu.memory_space<vmem>>, %arg6: memref<1x64xf32, #tpu.memory_space<vmem>>, %arg7: memref<1x8x64xf32, #tpu.memory_space<vmem>>) attributes {dimension_semantics = [#tpu.dimension_semantics<parallel>], iteration_bounds = array<i64: 2>, scalar_prefetch = 0 : i64, scratch_operands = 0 : i64, tpu.core_type = #tpu.core_type<tc>, window_params = [{transform_indices = @transform_0, window_bounds = array<i64: 1, 8, 64>}, {pipeline_mode = #tpu.pipeline_mode<synchronous>, transform_indices = @transform_1, window_bounds = array<i64: 1, 64>}, {pipeline_mode = #tpu.pipeline_mode<synchronous>, transform_indices = @transform_2, window_bounds = array<i64: 1, 64>}, {pipeline_mode = #tpu.pipeline_mode<synchronous>, transform_indices = @transform_3, window_bounds = array<i64: 64, 192>}, {pipeline_mode = #tpu.pipeline_mode<synchronous>, transform_indices = @transform_4, window_bounds = array<i64: 64, 64>}, {pipeline_mode = #tpu.pipeline_mode<synchronous>, transform_indices = @transform_5, window_bounds = array<i64: 1, 64>}, {transform_indices = @transform_6, window_bounds = array<i64: 1, 8, 64>}]} {
    %c0 = arith.constant 0 : index
    %c0_0 = arith.constant 0 : index
    %c0_1 = arith.constant 0 : index
    %0 = vector.load %arg1[%c0, %c0_0, %c0_1] : memref<1x8x64xf32, #tpu.memory_space<vmem>>, vector<1x8x64xf32>
    %1 = vector.shape_cast %0 : vector<1x8x64xf32> to vector<8x64xf32>
    %c0_2 = arith.constant 0 : index
    %c0_3 = arith.constant 0 : index
    %2 = vector.load %arg2[%c0_2, %c0_3] : memref<1x64xf32, #tpu.memory_space<vmem>>, vector<1x64xf32>
    %c0_4 = arith.constant 0 : index
    %c0_5 = arith.constant 0 : index
    %3 = vector.load %arg3[%c0_4, %c0_5] : memref<1x64xf32, #tpu.memory_space<vmem>>, vector<1x64xf32>
    %cst = arith.constant dense<0.000000e+00> : vector<8xf32>
    %4 = vector.multi_reduction <add>, %1, %cst [1] : vector<8x64xf32> to vector<8xf32>
    %5 = vector.shape_cast %4 : vector<8xf32> to vector<8x1xf32>
    %cst_6 = arith.constant 6.400000e+01 : f32
    %6 = vector.broadcast %cst_6 : f32 to vector<8x1xf32>
    %7 = arith.divf %5, %6 : vector<8x1xf32>
    %8 = vector.broadcast %7 : vector<8x1xf32> to vector<8x64xf32>
    %9 = arith.subf %1, %8 : vector<8x64xf32>
    %10 = arith.mulf %9, %9 : vector<8x64xf32>
    %cst_7 = arith.constant dense<0.000000e+00> : vector<8xf32>
    %11 = vector.multi_reduction <add>, %10, %cst_7 [1] : vector<8x64xf32> to vector<8xf32>
    %12 = vector.shape_cast %11 : vector<8xf32> to vector<8x1xf32>
    %cst_8 = arith.constant 6.400000e+01 : f32
    %13 = vector.broadcast %cst_8 : f32 to vector<8x1xf32>
    %14 = arith.divf %12, %13 : vector<8x1xf32>
    %15 = vector.broadcast %7 : vector<8x1xf32> to vector<8x64xf32>
    %16 = arith.subf %1, %15 : vector<8x64xf32>
    %cst_9 = arith.constant 9.99999974E-6 : f32
    %17 = vector.broadcast %cst_9 : f32 to vector<8x1xf32>
    %18 = arith.addf %14, %17 : vector<8x1xf32>
    %19 = math.rsqrt %18 : vector<8x1xf32>
    %20 = vector.broadcast %19 : vector<8x1xf32> to vector<8x64xf32>
    %21 = arith.mulf %16, %20 : vector<8x64xf32>
    %22 = vector.broadcast %2 : vector<1x64xf32> to vector<8x64xf32>
    %23 = arith.mulf %21, %22 : vector<8x64xf32>
    %24 = vector.broadcast %3 : vector<1x64xf32> to vector<8x64xf32>
    %25 = arith.addf %23, %24 : vector<8x64xf32>
    %26 = arith.truncf %25 : vector<8x64xf32> to vector<8x64xbf16>
    %c0_10 = arith.constant 0 : index
    %c0_11 = arith.constant 0 : index
    %27 = vector.load %arg4[%c0_10, %c0_11] : memref<64x192xbf16, #tpu.memory_space<vmem>>, vector<64x192xbf16>
    %cst_12 = arith.constant dense<0.000000e+00> : vector<8x192xf32>
    %28 = tpu.matmul %26, %27, %cst_12 {dimension_numbers = #tpu.dot_dimension_numbers<[1], [0], [0], [1], [0, 0, 1, 1], [], []>} : vector<8x64xbf16>, vector<64x192xbf16>, vector<8x192xf32> -> vector<8x192xf32>
    %29 = tpu.iota {dimensions = array<i32: 0>} : vector<8x8xi32>
    %30 = tpu.iota {dimensions = array<i32: 1>} : vector<8x8xi32>
    %31 = arith.cmpi sle, %30, %29 : vector<8x8xi32>
    %cst_13 = arith.constant 0.000000e+00 : f32
    %32 = vector.broadcast %cst_13 : f32 to vector<8x64xf32>
    %33 = vector.extract_strided_slice %28 {offsets = [0, 0], sizes = [8, 16], strides = [1, 1]} : vector<8x192xf32> to vector<8x16xf32>
    %34 = vector.extract_strided_slice %28 {offsets = [0, 64], sizes = [8, 16], strides = [1, 1]} : vector<8x192xf32> to vector<8x16xf32>
    %35 = vector.extract_strided_slice %28 {offsets = [0, 128], sizes = [8, 16], strides = [1, 1]} : vector<8x192xf32> to vector<8x16xf32>
    %36 = arith.truncf %33 : vector<8x16xf32> to vector<8x16xbf16>
    %37 = arith.truncf %34 : vector<8x16xf32> to vector<8x16xbf16>
    "tpu.trace_start"() <{level = 10 : i32, message = "nd,md->nm"}> : () -> ()
    %cst_14 = arith.constant dense<0.000000e+00> : vector<8x8xf32>
    %38 = tpu.matmul %36, %37, %cst_14 {dimension_numbers = #tpu.dot_dimension_numbers<[1], [1], [0], [0], [0, 0, 1, 0], [], []>} : vector<8x16xbf16>, vector<8x16xbf16>, vector<8x8xf32> -> vector<8x8xf32>
    "tpu.trace_stop"() : () -> ()
    %cst_15 = arith.constant 2.500000e-01 : f32
    %39 = vector.broadcast %cst_15 : f32 to vector<8x8xf32>
    %40 = arith.mulf %38, %39 : vector<8x8xf32>
    %cst_16 = arith.constant -1.000000e+30 : f32
    %41 = vector.broadcast %cst_16 : f32 to vector<8x8xf32>
    %42 = arith.select %31, %40, %41 : vector<8x8xi1>, vector<8x8xf32>
    %cst_17 = arith.constant dense<0xFF800000> : vector<8xf32>
    %43 = vector.multi_reduction <maximumf>, %42, %cst_17 [1] : vector<8x8xf32> to vector<8xf32>
    %44 = vector.shape_cast %43 : vector<8xf32> to vector<8x1xf32>
    %45 = vector.broadcast %44 : vector<8x1xf32> to vector<8x8xf32>
    %46 = arith.subf %42, %45 : vector<8x8xf32>
    %47 = math.exp %46 : vector<8x8xf32>
    %cst_18 = arith.constant dense<0.000000e+00> : vector<8xf32>
    %48 = vector.multi_reduction <add>, %47, %cst_18 [1] : vector<8x8xf32> to vector<8xf32>
    %49 = vector.shape_cast %48 : vector<8xf32> to vector<8x1xf32>
    %50 = arith.truncf %47 : vector<8x8xf32> to vector<8x8xbf16>
    %51 = arith.truncf %35 : vector<8x16xf32> to vector<8x16xbf16>
    %cst_19 = arith.constant dense<0.000000e+00> : vector<8x16xf32>
    %52 = tpu.matmul %50, %51, %cst_19 {dimension_numbers = #tpu.dot_dimension_numbers<[1], [0], [0], [1], [0, 0, 1, 1], [], []>} : vector<8x8xbf16>, vector<8x16xbf16>, vector<8x16xf32> -> vector<8x16xf32>
    %53 = tpu.reciprocal %49 {approx = true} : vector<8x1xf32> -> vector<8x1xf32>
    %54 = vector.broadcast %53 : vector<8x1xf32> to vector<8x16xf32>
    %55 = arith.mulf %52, %54 : vector<8x16xf32>
    %c0_20 = arith.constant 0 : index
    %c0_21 = arith.constant 0 : index
    %56 = vector.load %arg5[%c0_20, %c0_21] : memref<64x64xbf16, #tpu.memory_space<vmem>>, vector<16x64xbf16>
    %57 = arith.truncf %55 : vector<8x16xf32> to vector<8x16xbf16>
    %cst_22 = arith.constant dense<0.000000e+00> : vector<8x64xf32>
    %58 = tpu.matmul %57, %56, %cst_22 {dimension_numbers = #tpu.dot_dimension_numbers<[1], [0], [0], [1], [0, 0, 1, 1], [], []>} : vector<8x16xbf16>, vector<16x64xbf16>, vector<8x64xf32> -> vector<8x64xf32>
    %59 = arith.addf %32, %58 : vector<8x64xf32>
    %60 = vector.extract_strided_slice %28 {offsets = [0, 16], sizes = [8, 16], strides = [1, 1]} : vector<8x192xf32> to vector<8x16xf32>
    %61 = vector.extract_strided_slice %28 {offsets = [0, 80], sizes = [8, 16], strides = [1, 1]} : vector<8x192xf32> to vector<8x16xf32>
    %62 = vector.extract_strided_slice %28 {offsets = [0, 144], sizes = [8, 16], strides = [1, 1]} : vector<8x192xf32> to vector<8x16xf32>
    %63 = arith.truncf %60 : vector<8x16xf32> to vector<8x16xbf16>
    %64 = arith.truncf %61 : vector<8x16xf32> to vector<8x16xbf16>
    "tpu.trace_start"() <{level = 10 : i32, message = "nd,md->nm"}> : () -> ()
    %cst_23 = arith.constant dense<0.000000e+00> : vector<8x8xf32>
    %65 = tpu.matmul %63, %64, %cst_23 {dimension_numbers = #tpu.dot_dimension_numbers<[1], [1], [0], [0], [0, 0, 1, 0], [], []>} : vector<8x16xbf16>, vector<8x16xbf16>, vector<8x8xf32> -> vector<8x8xf32>
    "tpu.trace_stop"() : () -> ()
    %cst_24 = arith.constant 2.500000e-01 : f32
    %66 = vector.broadcast %cst_24 : f32 to vector<8x8xf32>
    %67 = arith.mulf %65, %66 : vector<8x8xf32>
    %cst_25 = arith.constant -1.000000e+30 : f32
    %68 = vector.broadcast %cst_25 : f32 to vector<8x8xf32>
    %69 = arith.select %31, %67, %68 : vector<8x8xi1>, vector<8x8xf32>
    %cst_26 = arith.constant dense<0xFF800000> : vector<8xf32>
    %70 = vector.multi_reduction <maximumf>, %69, %cst_26 [1] : vector<8x8xf32> to vector<8xf32>
    %71 = vector.shape_cast %70 : vector<8xf32> to vector<8x1xf32>
    %72 = vector.broadcast %71 : vector<8x1xf32> to vector<8x8xf32>
    %73 = arith.subf %69, %72 : vector<8x8xf32>
    %74 = math.exp %73 : vector<8x8xf32>
    %cst_27 = arith.constant dense<0.000000e+00> : vector<8xf32>
    %75 = vector.multi_reduction <add>, %74, %cst_27 [1] : vector<8x8xf32> to vector<8xf32>
    %76 = vector.shape_cast %75 : vector<8xf32> to vector<8x1xf32>
    %77 = arith.truncf %74 : vector<8x8xf32> to vector<8x8xbf16>
    %78 = arith.truncf %62 : vector<8x16xf32> to vector<8x16xbf16>
    %cst_28 = arith.constant dense<0.000000e+00> : vector<8x16xf32>
    %79 = tpu.matmul %77, %78, %cst_28 {dimension_numbers = #tpu.dot_dimension_numbers<[1], [0], [0], [1], [0, 0, 1, 1], [], []>} : vector<8x8xbf16>, vector<8x16xbf16>, vector<8x16xf32> -> vector<8x16xf32>
    %80 = tpu.reciprocal %76 {approx = true} : vector<8x1xf32> -> vector<8x1xf32>
    %81 = vector.broadcast %80 : vector<8x1xf32> to vector<8x16xf32>
    %82 = arith.mulf %79, %81 : vector<8x16xf32>
    %c16 = arith.constant 16 : index
    %c0_29 = arith.constant 0 : index
    %83 = vector.load %arg5[%c16, %c0_29] : memref<64x64xbf16, #tpu.memory_space<vmem>>, vector<16x64xbf16>
    %84 = arith.truncf %82 : vector<8x16xf32> to vector<8x16xbf16>
    %cst_30 = arith.constant dense<0.000000e+00> : vector<8x64xf32>
    %85 = tpu.matmul %84, %83, %cst_30 {dimension_numbers = #tpu.dot_dimension_numbers<[1], [0], [0], [1], [0, 0, 1, 1], [], []>} : vector<8x16xbf16>, vector<16x64xbf16>, vector<8x64xf32> -> vector<8x64xf32>
    %86 = arith.addf %59, %85 : vector<8x64xf32>
    %87 = vector.extract_strided_slice %28 {offsets = [0, 32], sizes = [8, 16], strides = [1, 1]} : vector<8x192xf32> to vector<8x16xf32>
    %88 = vector.extract_strided_slice %28 {offsets = [0, 96], sizes = [8, 16], strides = [1, 1]} : vector<8x192xf32> to vector<8x16xf32>
    %89 = vector.extract_strided_slice %28 {offsets = [0, 160], sizes = [8, 16], strides = [1, 1]} : vector<8x192xf32> to vector<8x16xf32>
    %90 = arith.truncf %87 : vector<8x16xf32> to vector<8x16xbf16>
    %91 = arith.truncf %88 : vector<8x16xf32> to vector<8x16xbf16>
    "tpu.trace_start"() <{level = 10 : i32, message = "nd,md->nm"}> : () -> ()
    %cst_31 = arith.constant dense<0.000000e+00> : vector<8x8xf32>
    %92 = tpu.matmul %90, %91, %cst_31 {dimension_numbers = #tpu.dot_dimension_numbers<[1], [1], [0], [0], [0, 0, 1, 0], [], []>} : vector<8x16xbf16>, vector<8x16xbf16>, vector<8x8xf32> -> vector<8x8xf32>
    "tpu.trace_stop"() : () -> ()
    %cst_32 = arith.constant 2.500000e-01 : f32
    %93 = vector.broadcast %cst_32 : f32 to vector<8x8xf32>
    %94 = arith.mulf %92, %93 : vector<8x8xf32>
    %cst_33 = arith.constant -1.000000e+30 : f32
    %95 = vector.broadcast %cst_33 : f32 to vector<8x8xf32>
    %96 = arith.select %31, %94, %95 : vector<8x8xi1>, vector<8x8xf32>
    %cst_34 = arith.constant dense<0xFF800000> : vector<8xf32>
    %97 = vector.multi_reduction <maximumf>, %96, %cst_34 [1] : vector<8x8xf32> to vector<8xf32>
    %98 = vector.shape_cast %97 : vector<8xf32> to vector<8x1xf32>
    %99 = vector.broadcast %98 : vector<8x1xf32> to vector<8x8xf32>
    %100 = arith.subf %96, %99 : vector<8x8xf32>
    %101 = math.exp %100 : vector<8x8xf32>
    %cst_35 = arith.constant dense<0.000000e+00> : vector<8xf32>
    %102 = vector.multi_reduction <add>, %101, %cst_35 [1] : vector<8x8xf32> to vector<8xf32>
    %103 = vector.shape_cast %102 : vector<8xf32> to vector<8x1xf32>
    %104 = arith.truncf %101 : vector<8x8xf32> to vector<8x8xbf16>
    %105 = arith.truncf %89 : vector<8x16xf32> to vector<8x16xbf16>
    %cst_36 = arith.constant dense<0.000000e+00> : vector<8x16xf32>
    %106 = tpu.matmul %104, %105, %cst_36 {dimension_numbers = #tpu.dot_dimension_numbers<[1], [0], [0], [1], [0, 0, 1, 1], [], []>} : vector<8x8xbf16>, vector<8x16xbf16>, vector<8x16xf32> -> vector<8x16xf32>
    %107 = tpu.reciprocal %103 {approx = true} : vector<8x1xf32> -> vector<8x1xf32>
    %108 = vector.broadcast %107 : vector<8x1xf32> to vector<8x16xf32>
    %109 = arith.mulf %106, %108 : vector<8x16xf32>
    %c32 = arith.constant 32 : index
    %c0_37 = arith.constant 0 : index
    %110 = vector.load %arg5[%c32, %c0_37] : memref<64x64xbf16, #tpu.memory_space<vmem>>, vector<16x64xbf16>
    %111 = arith.truncf %109 : vector<8x16xf32> to vector<8x16xbf16>
    %cst_38 = arith.constant dense<0.000000e+00> : vector<8x64xf32>
    %112 = tpu.matmul %111, %110, %cst_38 {dimension_numbers = #tpu.dot_dimension_numbers<[1], [0], [0], [1], [0, 0, 1, 1], [], []>} : vector<8x16xbf16>, vector<16x64xbf16>, vector<8x64xf32> -> vector<8x64xf32>
    %113 = arith.addf %86, %112 : vector<8x64xf32>
    %114 = vector.extract_strided_slice %28 {offsets = [0, 48], sizes = [8, 16], strides = [1, 1]} : vector<8x192xf32> to vector<8x16xf32>
    %115 = vector.extract_strided_slice %28 {offsets = [0, 112], sizes = [8, 16], strides = [1, 1]} : vector<8x192xf32> to vector<8x16xf32>
    %116 = vector.extract_strided_slice %28 {offsets = [0, 176], sizes = [8, 16], strides = [1, 1]} : vector<8x192xf32> to vector<8x16xf32>
    %117 = arith.truncf %114 : vector<8x16xf32> to vector<8x16xbf16>
    %118 = arith.truncf %115 : vector<8x16xf32> to vector<8x16xbf16>
    "tpu.trace_start"() <{level = 10 : i32, message = "nd,md->nm"}> : () -> ()
    %cst_39 = arith.constant dense<0.000000e+00> : vector<8x8xf32>
    %119 = tpu.matmul %117, %118, %cst_39 {dimension_numbers = #tpu.dot_dimension_numbers<[1], [1], [0], [0], [0, 0, 1, 0], [], []>} : vector<8x16xbf16>, vector<8x16xbf16>, vector<8x8xf32> -> vector<8x8xf32>
    "tpu.trace_stop"() : () -> ()
    %cst_40 = arith.constant 2.500000e-01 : f32
    %120 = vector.broadcast %cst_40 : f32 to vector<8x8xf32>
    %121 = arith.mulf %119, %120 : vector<8x8xf32>
    %cst_41 = arith.constant -1.000000e+30 : f32
    %122 = vector.broadcast %cst_41 : f32 to vector<8x8xf32>
    %123 = arith.select %31, %121, %122 : vector<8x8xi1>, vector<8x8xf32>
    %cst_42 = arith.constant dense<0xFF800000> : vector<8xf32>
    %124 = vector.multi_reduction <maximumf>, %123, %cst_42 [1] : vector<8x8xf32> to vector<8xf32>
    %125 = vector.shape_cast %124 : vector<8xf32> to vector<8x1xf32>
    %126 = vector.broadcast %125 : vector<8x1xf32> to vector<8x8xf32>
    %127 = arith.subf %123, %126 : vector<8x8xf32>
    %128 = math.exp %127 : vector<8x8xf32>
    %cst_43 = arith.constant dense<0.000000e+00> : vector<8xf32>
    %129 = vector.multi_reduction <add>, %128, %cst_43 [1] : vector<8x8xf32> to vector<8xf32>
    %130 = vector.shape_cast %129 : vector<8xf32> to vector<8x1xf32>
    %131 = arith.truncf %128 : vector<8x8xf32> to vector<8x8xbf16>
    %132 = arith.truncf %116 : vector<8x16xf32> to vector<8x16xbf16>
    %cst_44 = arith.constant dense<0.000000e+00> : vector<8x16xf32>
    %133 = tpu.matmul %131, %132, %cst_44 {dimension_numbers = #tpu.dot_dimension_numbers<[1], [0], [0], [1], [0, 0, 1, 1], [], []>} : vector<8x8xbf16>, vector<8x16xbf16>, vector<8x16xf32> -> vector<8x16xf32>
    %134 = tpu.reciprocal %130 {approx = true} : vector<8x1xf32> -> vector<8x1xf32>
    %135 = vector.broadcast %134 : vector<8x1xf32> to vector<8x16xf32>
    %136 = arith.mulf %133, %135 : vector<8x16xf32>
    %c48 = arith.constant 48 : index
    %c0_45 = arith.constant 0 : index
    %137 = vector.load %arg5[%c48, %c0_45] : memref<64x64xbf16, #tpu.memory_space<vmem>>, vector<16x64xbf16>
    %138 = arith.truncf %136 : vector<8x16xf32> to vector<8x16xbf16>
    %cst_46 = arith.constant dense<0.000000e+00> : vector<8x64xf32>
    %139 = tpu.matmul %138, %137, %cst_46 {dimension_numbers = #tpu.dot_dimension_numbers<[1], [0], [0], [1], [0, 0, 1, 1], [], []>} : vector<8x16xbf16>, vector<16x64xbf16>, vector<8x64xf32> -> vector<8x64xf32>
    %140 = arith.addf %113, %139 : vector<8x64xf32>
    %c0_47 = arith.constant 0 : index
    %c0_48 = arith.constant 0 : index
    %141 = vector.load %arg6[%c0_47, %c0_48] : memref<1x64xf32, #tpu.memory_space<vmem>>, vector<1x64xf32>
    %142 = vector.broadcast %141 : vector<1x64xf32> to vector<8x64xf32>
    %143 = arith.addf %140, %142 : vector<8x64xf32>
    %144 = arith.addf %143, %1 : vector<8x64xf32>
    %c0_49 = arith.constant 0 : index
    %c0_50 = arith.constant 0 : index
    %c0_51 = arith.constant 0 : index
    %145 = vector.load %arg7[%c0_49, %c0_50, %c0_51] : memref<1x8x64xf32, #tpu.memory_space<vmem>>, vector<1x8x64xf32>
    %146 = vector.shape_cast %145 : vector<1x8x64xf32> to vector<8x64xf32>
    %147 = vector.shape_cast %144 : vector<8x64xf32> to vector<1x8x64xf32>
    tpu.vector_store %arg7[%c0_49, %c0_50, %c0_51], %147 {strides = array<i32>} : memref<1x8x64xf32, #tpu.memory_space<vmem>>, vector<1x8x64xf32>,
    return
  }
  func.func @transform_0(%arg0: i32) -> (i32, i32, i32) {
    %c0_i32 = arith.constant 0 : i32
    %c0_i32_0 = arith.constant 0 : i32
    %c0_i32_1 = arith.constant 0 : i32
    return %arg0, %c0_i32, %c0_i32_0 : i32, i32, i32
  }
  func.func @transform_1(%arg0: i32) -> (i32, i32) {
    %c0_i32 = arith.constant 0 : i32
    %c0_i32_0 = arith.constant 0 : i32
    %c0_i32_1 = arith.constant 0 : i32
    return %c0_i32, %c0_i32_0 : i32, i32
  }
  func.func @transform_2(%arg0: i32) -> (i32, i32) {
    %c0_i32 = arith.constant 0 : i32
    %c0_i32_0 = arith.constant 0 : i32
    %c0_i32_1 = arith.constant 0 : i32
    return %c0_i32, %c0_i32_0 : i32, i32
  }
  func.func @transform_3(%arg0: i32) -> (i32, i32) {
    %c0_i32 = arith.constant 0 : i32
    %c0_i32_0 = arith.constant 0 : i32
    %c0_i32_1 = arith.constant 0 : i32
    return %c0_i32, %c0_i32_0 : i32, i32
  }
  func.func @transform_4(%arg0: i32) -> (i32, i32) {
    %c0_i32 = arith.constant 0 : i32
    %c0_i32_0 = arith.constant 0 : i32
    %c0_i32_1 = arith.constant 0 : i32
    return %c0_i32, %c0_i32_0 : i32, i32
  }
  func.func @transform_5(%arg0: i32) -> (i32, i32) {
    %c0_i32 = arith.constant 0 : i32
    %c0_i32_0 = arith.constant 0 : i32
    %c0_i32_1 = arith.constant 0 : i32
    return %c0_i32, %c0_i32_0 : i32, i32
  }
  func.func @transform_6(%arg0: i32) -> (i32, i32, i32) {
    %c0_i32 = arith.constant 0 : i32
    %c0_i32_0 = arith.constant 0 : i32
    %c0_i32_1 = arith.constant 0 : i32
    return %arg0, %c0_i32, %c0_i32_0 : i32, i32, i32
  }
}

</mosaic_0001>

<bundles_post_ra>
// kernel: tpu_custom_call.1
= control target key start
LH: loop header
LB: loop body
LE: loop exit
PB: predicated region body
PF: predicated region fallthrough
CT: control target
= control target key end

     0   :  { %11 = vsyncpa [#allocation3], 0  ;;  %s2023_s0 = inlined_call_operand.hbm [shape: f32[2,8,64], index: 0, kind: input, shape index: {}]   ;;  %s2024_s1 = inlined_call_operand.vmem [shape: f32[1,64], index: 1, kind: input, shape index: {}]   ;;  %s2025_s2 = inlined_call_operand.vmem [shape: f32[1,64], index: 2, kind: input, shape index: {}]   ;;  %s2026_s3 = inlined_call_operand.hbm [shape: bf16[64,192], index: 3, kind: input, shape index: {}]   ;;  %s2027_s4 = inlined_call_operand.hbm [shape: bf16[64,64], index: 4, kind: input, shape index: {}]   ;;  %s2028_s5 = inlined_call_operand.vmem [shape: f32[1,64], index: 5, kind: input, shape index: {}]   ;;  %s2029_s6 = inlined_call_operand.hbm [shape: f32[2,8,64], index: 6, kind: output, shape index: {}]  }
   0x1   :  { %13 = vsyncpa [#allocation3 + $0x1], 0 }
   0x2   :  { %14 = vsyncpa [#allocation6], 0 }
   0x3   :  { %15 = vsyncpa [#allocation4], 0 }
   0x4   :  { %17 = vsyncpa [#allocation4 + $0x1], 0  ;;  %s1667_s21 = smov 0   ;;  %s1669_s22 = smov 0  }
   0x5   :  { %s1671_s23 = smov 0   ;;  %s1673_s24 = smov 0  }
   0x6 LB: > { %s1688_s25 = sadd.s32 4294967295, %s1612_s24   ;;  %s1201_s26 = sadd.s32 4294967294, %s1612_s24   ;;  %s1612_s24 = sphi %s1673_s24, %s2049_s24   ;;  %s1608_s23 = sphi %s1671_s23, %s2048_s23   ;;  %s1604_s22 = sphi %s1669_s22, %s2047_s22   ;;  %s1600_s21 = sphi %s1667_s21, %s2046_s21  }
   0x7   : > { %p43_p0 = scmp.ne.s32.totalorder %s1604_s22, %s1600_s21  ;;  %p2030_p1 = scmp.eq.s32.totalorder %s1688_s25, 0 }
   0x8   : > { %p178_p3 = scmp.eq.s32.totalorder %s1201_s26, 1  ;;  %p1202_p5 = scmp.ge.s32.totalorder %s1612_s24, 1 }
   0x9   : > { %p1697_p4 = por %p2030_p1, %p43_p0  ;;  %p185_p7 = scmp.lt.s32.totalorder %s1612_s24, 3 }
   0xa   : > { %p1702_p6 = por %p178_p3, %p43_p0  ;;  %s1614_s30 = smov [#allocation5]  }
   0xb   : > { %s2033_s27 = scalar_select %p1697_p4, 1, 0 }
   0xc   : > { %s2034_s28 = scalar_select %p1702_p6, 1, 0 }
   0xd   : > { %p1707_p8 = pnand %p1202_p5, %p185_p7  ;;  %s203_s7 = sshll.u32 %s1614_s30, 4  ;;  %s1711_s7 = int_to_ptr.vmem [resolvable:$true] %s203_s7 }
   0xe   : > { %s1615_s9 = smov [#allocation7]   ;;  %s1456_s13 = scalar_lea.hbm %s2026_s3, 1024 }
   0xf   : > { %p1353_p9 = pneg %p1707_p8  ;;  %s216_s10 = sshll.u32 %s1615_s9, 4  ;;  %s1722_s10 = int_to_ptr.vmem [resolvable:$true] %s216_s10 }
  0x10   : > { %p1457_p12 = scmp.ne.s32.totalorder %s2026_s3, %s1456_s13  ;;  %p1463_p5 = scmp.lt.u32.totalorder %s1456_s13, %s2026_s3 }
  0x11   : > { %p1718_p11 = pnand %p1353_p9, %p2030_p1 }
  0x13   : > { %p1458_p13 = pneg %p1718_p11 }
  0x15   : > { %p1459_p0 = pnand %p1458_p13, %p1457_p12 }
  0x17   : > { %p1460_p3 = pneg %p1459_p0 }
  0x19   : > { %p1465_p7 = pnand %p1463_p5, %p1460_p3 }
  0x1b   : > { %1468 = shalt.err (!%p1465_p7)
}
  0x1c   : > { %s1469_s18 = scalar_lea.vmem %s1711_s7, 1024  ;;  %p1477_p2 = scmp.lt.s32.totalorder %s1711_s7, %s1711_s7 }
  0x1d   : > { %p1470_p9 = scmp.ne.s32.totalorder %s1711_s7, %s1469_s18  ;;  %p1478_p12 = scmp.lt.s32.totalorder %s1469_s18, %s1469_s18 }
  0x1f   : > { %p1472_p10 = pnand %p1470_p9, %p1458_p13  ;;  %p1479_p0 = por %p1478_p12, %p1477_p2 }
  0x21   : > { %p1473_p1 = pneg %p1472_p10 }
  0x23   : > { %p1480_p6 = pnand %p1479_p0, %p1473_p1 }
  0x25   : > { %1483 = shalt.err (!%p1480_p6)
}
  0x26   : > { %s1616_s19 = smov 128   ;;  %s1617_s20 = smov 8  }
  0x27   : > { %1356 = dma.hbm_to_vmem [thread:$0]  (!%p1718_p11), %s2026_s3, 1024, %s1711_s7, [#allocation6], %s1616_s19, %s1616_s19, %s1617_s20  }
  0x28   : > { %s1484_s12 = scalar_lea.hbm %s2027_s4, 512 }
  0x29   : > { %p1485_p2 = scmp.ne.s32.totalorder %s2027_s4, %s1484_s12  ;;  %p1491_p10 = scmp.lt.u32.totalorder %s1484_s12, %s2027_s4 }
  0x2b   : > { %p1487_p1 = pnand %p1485_p2, %p1458_p13 }
  0x2d   : > { %p1488_p6 = pneg %p1487_p1 }
  0x2f   : > { %p1493_p3 = pnand %p1491_p10, %p1488_p6 }
  0x31   : > { %1496 = shalt.err (!%p1493_p3)
}
  0x32   : > { %s1497_s7 = scalar_lea.vmem %s1722_s10, 512  ;;  %p1505_p12 = scmp.lt.s32.totalorder %s1722_s10, %s1722_s10 }
  0x33   : > { %p1498_p5 = scmp.ne.s32.totalorder %s1722_s10, %s1497_s7  ;;  %p1506_p0 = scmp.lt.s32.totalorder %s1497_s7, %s1497_s7 }
  0x35   : > { %p1500_p7 = pnand %p1498_p5, %p1458_p13  ;;  %p1507_p2 = por %p1506_p0, %p1505_p12 }
  0x37   : > { %p1501_p9 = pneg %p1500_p7 }
  0x39   : > { %p1508_p1 = pnand %p1507_p2, %p1501_p9 }
  0x3b   : > { %1511 = shalt.err (!%p1508_p1)
}
  0x3c   : > { %s1618_s17 = smov 64   ;;  %s1619_s18 = smov 4  }
  0x3d   : > { %1359 = dma.hbm_to_vmem [thread:$0]  (!%p1718_p11), %s2027_s4, 512, %s1722_s10, [#allocation6], %s1618_s17, %s1618_s17, %s1619_s18  }
  0x3e   : > { %s1777_s26 = sadd.s32 1, %s1612_s24   ;;  %s30_s9 = sadd.s32 1, %s1608_s23 }
  0x3f   : > { %s27_s30 = ssub.s32 %s1612_s24, %s1777_s26  ;;  %p37_p6 = scmp.ne.s32.totalorder %s1608_s23, %s1604_s22 }
  0x40   : > { %p28_p13 = scmp.eq.s32.totalorder %s27_s30, 0  ;;  %p38_p10 = scmp.eq.s32.totalorder %s1612_s24, 0 }
  0x41   : > { %p2037_p5 = scmp.eq.s32.totalorder %s1688_s25, 1  ;;  %p1370_p9 = scmp.lt.s32.totalorder %s1612_s24, 2 }
  0x42   : > { %s1786_s11 = scalar_select %p28_p13, %s1608_s23, %s30_s9  }
  0x43   : > { %p39_p3 = por %p38_p10, %p37_p6  ;;  %p1790_p7 = por %p2037_p5, %p37_p6 }
  0x44   : > { %s233_s8 = sand.u32 1, %s1608_s23   ;;  %s1207_s10 = sshll.u32 %s1612_s24, 7 }
  0x45   : > { %s2038_s12 = scalar_select %p1790_p7, 1, 0 }
  0x46   : > { %s1206_s13 = sshll.u32 %s233_s8, 3  ;;  %s1800_s16 = scalar_lea.hbm %s2023_s0, %s1207_s10 }
  0x47   : > { %s237_s7 = scalar_lea.vmem [#allocation2], %s1206_s13  ;;  %p1804_p11 = pnand %p1370_p9, %p39_p3 }
  0x48   : > { %s244_s17 = sshll.u32 %s237_s7, 4  ;;  %s234_s19 = scalar_lea.sflag [#allocation3], %s233_s8  ;;  %s1802_s17 = int_to_ptr.vmem [resolvable:$true] %s244_s17 }
  0x49   : > { %s1512_s20 = scalar_lea.hbm %s1800_s16, 128  ;;  %p1514_p0 = pneg %p1804_p11 }
  0x4a   : > { %p1513_p12 = scmp.ne.s32.totalorder %s1800_s16, %s1512_s20  ;;  %s1517_s13 = scalar_lea.hbm %s2023_s0, 256 }
  0x4b   : > { %p1518_p13 = scmp.lt.u32.totalorder %s1800_s16, %s2023_s0  ;;  %p1519_p6 = scmp.lt.u32.totalorder %s1517_s13, %s1512_s20 }
  0x4c   : > { %p1515_p2 = pnand %p1514_p0, %p1513_p12  ;;  %p1521_p3 = scmp.lt.u32.totalorder %s1512_s20, %s1800_s16 }
  0x4d   : > { %p1520_p10 = por %p1519_p6, %p1518_p13 }
  0x4e   : > { %p1516_p1 = pneg %p1515_p2 }
  0x4f   : > { %p1522_p5 = por %p1521_p3, %p1520_p10 }
  0x51   : > { %p1523_p9 = pnand %p1522_p5, %p1516_p1 }
  0x53   : > { %1526 = shalt.err (!%p1523_p9)
}
  0x54   : > { %s1527_s8 = scalar_lea.vmem %s1802_s17, 128  ;;  %s1620_s15 = smov [#allocation2]  }
  0x55   : > { %p1528_p12 = scmp.ne.s32.totalorder %s1802_s17, %s1527_s8  ;;  %s1532_s7 = sshll.u32 %s1620_s15, 4  ;;  %s1533_s7 = int_to_ptr.vmem [resolvable:$false] %s1532_s7 }
  0x56   : > { %s1534_s30 = scalar_lea.vmem %s1533_s7, 256  ;;  %p1535_p4 = scmp.lt.s32.totalorder %s1802_s17, %s1533_s7 }
  0x57   : > { %p1530_p2 = pnand %p1528_p12, %p1514_p0  ;;  %p1536_p13 = scmp.lt.s32.totalorder %s1534_s30, %s1527_s8 }
  0x59   : > { %p1531_p7 = pneg %p1530_p2  ;;  %p1537_p6 = por %p1536_p13, %p1535_p4 }
  0x5b   : > { %p1538_p10 = pnand %p1537_p6, %p1531_p7 }
  0x5d   : > { %1541 = shalt.err (!%p1538_p10)
}
  0x5e   : > { %1363 = dma.hbm_to_vmem [thread:$0]  (!%p1804_p11), %s1800_s16, 128, %s1802_s17, %s234_s19  }
  0x5f   : > { %253 = sbr.rel (%p1707_p8) target bundleno = 2572 (0xa0c), region = 44  ;;  %s1836_s20 = sand.u32 (!%p1707_p8), 1, %s1604_s22  }
  0x60   : > { %s1209_s9 = sshll.u32 (!%p1707_p8), %s1836_s20, 3  ;;  %s256_s13 = scalar_lea.sflag (!%p1707_p8), [#allocation3], %s1836_s20 }
  0x61   : > { %s259_s10 = scalar_lea.vmem (!%p1707_p8), [#allocation2], %s1209_s9  ;;  %p2040_p4 = scmp.ne.s32.totalorder (!%p1707_p8), %s2033_s27, 0 }
  0x66   : > { %1587 = dma.done.wait (%p2040_p4), %s256_s13, 128  }
  0x67   : > { %1589 = vsyncadd (%p2040_p4), %s256_s13, 4294967168  ;;  %p2041_p7 = scmp.eq.s32.totalorder %s1688_s25, 0 }
  0x69   : > { %1591 = dma.done.wait (%p2041_p7), [#allocation6], 1536   ;;  %p2042_p8 = pmov %p2041_p7 }
  0x6a   : > { %vm300_vm0 = vcmask 523264   ;;  %v1850_v0 = vld [vmem:[%s259_s10] sm:$0xff]  ;;  %v1422_v7 = vld [vmem:[#allocation5 + $0x4] ss:$8 sps:$4 sm:$0xff]   ;;  %v1424_v8 = vld [vmem:[#allocation5] ss:$8 sps:$4 sm:$0xff]   ;;  %v422_v39 = vlaneseq }
  0x6b   : > { %1593 = vsyncadd (%p2042_p8), [#allocation6], 4294965760  ;;  %v301_v1 = vsel %vm300_vm0, %v1850_v0, 0.0  ;;  %v1425_v9 = vld [vmem:[#allocation5 + $0x14] ss:$8 sps:$4 sm:$0xff]   ;;  %381 = vmatprep.subr.bf16.mxu0 %v1422_v7  ;;  %v1621_v11 = vmov 0  }
  0x6c   : > { %302 = vadd.xlane.f32.xlu0 %v301_v1  ;;  %382 = vmatpush1.bf16.msra.mxu0 %v1424_v8  ;;  %v1427_v10 = vld [vmem:[#allocation5 + $0x10] ss:$8 sps:$4 sm:$0xff]   ;;  %v1428_v12 = vld [vmem:[#allocation5 + $0x24] ss:$8 sps:$4 sm:$0xff]   ;;  %v1430_v13 = vld [vmem:[#allocation5 + $0x20] ss:$8 sps:$4 sm:$0xff]  }
  0x6d   : > { %413 = vmatprep.mubr.bf16.mxu0 %v1621_v11  ;;  %383 = vmatprep.subr.bf16.mxu0 %v1425_v9  ;;  %v1431_v14 = vld [vmem:[#allocation5 + $0x34] ss:$8 sps:$4 sm:$0xff]   ;;  %v1433_v15 = vld [vmem:[#allocation5 + $0x30] ss:$8 sps:$4 sm:$0xff]   ;;  %v1622_v26 = vmov 0.0   ;;  %vm1623_vm1 = vmmov 0  }
  0x6e   : > { %v1213_v20 = vld [vmem:[%s2024_s1] ss:$0 sm:$0xff]  ;;  %1269 = vmatprep.subr.bf16.mxu1 %v1622_v26  ;;  %1271 = vmatprep.mubr.msk.bf16.mxu1 %vm1623_vm1, %v1622_v26  ;;  %s1624_s18 = smov 112   ;;  %s1625_s19 = smov 64   ;;  %vm431_vm2 = vcmask 130048   ;;  %vm495_vm3 = vcmask 1043456  }
  0x6f   : > { %v1214_v22 = vld [vmem:[%s2025_s2] ss:$0 sm:$0xff]  ;;  %s1626_s14 = smov 48   ;;  %v1891_v40 = vshrl.u32 %v422_v39, 7  ;;  %v1893_v41 = vand.u32 127, %v422_v39  ;;  %vm480_vm5 = vcmask 64512  }
  0x70   : > { %384 = vmatpush1.bf16.msra.mxu0 %v1427_v10  ;;  %s1627_s8 = smov 32   ;;  %s1628_s15 = smov 96   ;;  %v1434_v7 = vld [vmem:[#allocation7] sm:$0xff]   ;;  %v1435_v8 = vld [vmem:[#allocation7 + $0x8] sm:$0xff]  }
  0x71   : > { %385 = vmatprep.subr.bf16.mxu0 %v1428_v12  ;;  %vm426_vm4 = vcmp.le.s32.totalorder %v1893_v41, %v1891_v40  ;;  %s1629_s7 = smov 80   ;;  %s1630_s30 = smov 16  }
  0x72   : > { %s1242_s27 = sshll.u32 %s1688_s25, 7  ;;  %s295_s29 = scalar_lea.vmem [#allocation8], %s1209_s9 }
  0x73   : > { %s1112_s16 = sshll.u32 %s295_s29, 4  ;;  %s1099_s25 = scalar_lea.sflag [#allocation4], %s1836_s20  ;;  %s1980_s16 = int_to_ptr.vmem [resolvable:$true] %s1112_s16 }
  0x74   : > { %386 = vmatpush1.bf16.msra.mxu0 %v1430_v13  ;;  %p2043_p0 = scmp.ne.s32.totalorder %s2038_s12, 0  ;;  %s1631_s9 = smov [#allocation8]  }
  0x75   : > { %387 = vmatprep.subr.bf16.mxu0 %v1431_v14 }
  0x78   : > { %388 = vmatpush1.bf16.msra.mxu0 %v1433_v15 }
  0x79   : > { %1281 = vmatprep.subr.bf16.mxu0 %v1622_v26 }
  0xf9   : > { %v303_v2 = vpop.xlane.xlu0 %302 }
  0xfa   : > { %v305_v3 = vmul.f32 0.015625, %v303_v2 }
  0xfc   : > { %v306_v4 = vsub.f32 %v1850_v0, %v305_v3 }
  0xfe   : > { %v307_v5 = vmul.f32 %v306_v4, %v306_v4 }
 0x100   : > { %v308_v6 = vsel %vm300_vm0, %v307_v5, 0.0 }
 0x101   : > { %309 = vadd.xlane.f32.xlu0 %v308_v6 }
 0x18e   : > { %v310_v16 = vpop.xlane.xlu0 %309 }
 0x18f   : > { %v311_v17 = vmul.f32 0.015625, %v310_v16 }
 0x191   : > { %v312_v18 = vadd.f32 1e-05, %v311_v17 }
 0x193   : > { %1438 = vrsqrt.f32 %v312_v18 }
 0x19d   : > { %v1439_v19 = vpop.eup %1438 }
 0x19e   : > { %v314_v21 = vmul.f32 %v1439_v19, %v306_v4 }
 0x1a0   : > { %v321_v23 = vmul.f32 %v1213_v20, %v314_v21 }
 0x1a2   : > { %v328_v24 = vadd.f32 %v1214_v22, %v321_v23 }
 0x1a4   : > { %v329_v25 = vpack.c.bf16 %v328_v24, %v328_v24 }
 0x1a6   : > { %1223 = vmatmul.mubr.msk.bf16.vlgmr.msra.gmra.mrb[0].mxu0 %vm300_vm0, %v329_v25 }
 0x1a7   : > { %1283 = vmatprep.mubr.msk.bf16.mxu0 %vm1623_vm1, %v1622_v26 }
 0x279   : > { %v415_v27 = vpop.f32.mrb[0].mxu0 }
 0x27a   : > { %v1869_v28 = vpack.c.bf16 %v415_v27, %v415_v27  ;;  %v417_v29 = vpop.f32.mrb[1].mxu0 }
 0x27b   : > { %v419_v30 = vpop.f32.mrb[2].mxu0  ;;  %v1877_v35 = vpack.c.bf16 %v417_v29, %v417_v29 }
 0x27c   : > { %544 = vrot.lane.b32.xlu0 %v1869_v28, %s1624_s18  ;;  %429 = vrot.lane.b32.xlu1 %v1869_v28, %s1625_s19  ;;  %v420_v31 = vpop.f32.mrb[3].mxu0  ;;  %s1978_s19 = scalar_lea.hbm %s2029_s6, %s1242_s27 }
 0x27d   : > { %v497_v37 = vsel %vm495_vm3, %v1877_v35, 0 }
 0x280   : > { %546 = vrot.lane.b32.xlu1 %v1869_v28, %s1626_s14  ;;  %s1542_s14 = scalar_lea.vmem %s1980_s16, 128 }
 0x281   : > { %p1543_p11 = scmp.ne.s32.totalorder %s1980_s16, %s1542_s14 }
 0x283   : > { %p1544_p1 = pnand %p1543_p11, %p2043_p0 }
 0x285   : > { %p1545_p3 = pneg %p1544_p1 }
 0x2ee   : > { %v430_v32 = vpop.permute.xlu1 %429  ;;  %v545_v38 = vpop.permute.xlu0 %544 }
 0x2ef   : > { %v436_v33 = vsel %vm431_vm2, %v430_v32, 0 }
 0x2f0   : > { %1270 = vmatpush3.bf16.xpose.msra.mxu1 %v436_v33 }
 0x2f1   : > { %1275 = vmatprep.subr.bf16.mxu1 %v1622_v26 }
 0x2f2   : > { %v547_v34 = vpop.permute.xlu1 %546 }
 0x2f3   : > { %v552_v36 = vsel %vm431_vm2, %v547_v34, 0 }
 0x2f4   : > { %1282 = vmatpush3.bf16.xpose.msra.mxu0 %v552_v36 }
 0x2f5   : > { %1293 = vmatprep.subr.bf16.mxu0 %v1622_v26 }
 0x2f7   : > { %1272 = vmatmul.mubr.msk.bf16.vlgmr.msra.gmra.mrb[0].mxu1 %vm431_vm2, %v1869_v28 }
 0x2f8   : > { %1276 = vmatpush3.bf16.msra.mxu1 %v497_v37  ;;  %1277 = vmatprep.mubr.msk.bf16.mxu1 %vm1623_vm1, %v1622_v26 }
 0x2f9   : > { %1287 = vmatprep.subr.bf16.mxu1 %v1622_v26 }
 0x2fb   : > { %1284 = vmatmul.mubr.msk.bf16.vlgmr.msra.gmra.mrb[4].mxu0 %vm431_vm2, %v545_v38 }
 0x2fc   : > { %1295 = vmatprep.mubr.msk.bf16.mxu0 %vm1623_vm1, %v1622_v26  ;;  %1294 = vmatpush3.bf16.msra.mxu0 %v1435_v8 }
 0x2fd   : > { %1305 = vmatprep.subr.bf16.mxu0 %v1622_v26 }
 0x3ca   : > { %v472_v42 = vpop.f32.mrb[0].mxu1 }
 0x3cb   : > { %v478_v43 = vmul.f32 0.25, %v472_v42  ;;  %v1273_v44 = vpop.f32.mrb[1].mxu1 }
 0x3cc   : > { %v475_v45 = vpop.f32.mrb[2].mxu1 }
 0x3cd   : > { %v1274_v46 = vpop.f32.mrb[3].mxu1  ;;  %v479_v47 = vsel %vm426_vm4, %v478_v43, -1e+30 }
 0x3ce   : > { %v588_v48 = vpop.f32.mrb[4].mxu0  ;;  %v481_v49 = vsel %vm480_vm5, %v479_v47, -inf }
 0x3cf   : > { %v594_v50 = vmul.f32 0.25, %v588_v48  ;;  %482 = vmax.xlane.f32.xlu1 %v481_v49  ;;  %v1285_v51 = vpop.f32.mrb[5].mxu0 }
 0x3d0   : > { %v591_v52 = vpop.f32.mrb[6].mxu0 }
 0x3d1   : > { %v1286_v53 = vpop.f32.mrb[7].mxu0  ;;  %v595_v54 = vsel %vm426_vm4, %v594_v50, -1e+30 }
 0x3d2   : > { %v596_v55 = vsel %vm480_vm5, %v595_v54, -inf }
 0x3d3   : > { %597 = vmax.xlane.f32.xlu0 %v596_v55 }
 0x3e0   : > { %607 = vrot.lane.b32.xlu1 %v1877_v35, %s1624_s18 }
 0x3e4   : > { %760 = vrot.lane.b32.xlu1 %v1869_v28, %s1627_s8  ;;  %s1546_s8 = sshll.u32 %s1631_s9, 4  ;;  %s1547_s8 = int_to_ptr.vmem [resolvable:$false] %s1546_s8 }
 0x3e5   : > { %p1549_p5 = scmp.lt.s32.totalorder %s1980_s16, %s1547_s8 }
 0x45c   : > { %v483_v56 = vpop.xlane.xlu1 %482 }
 0x45d   : > { %v484_v57 = vsub.f32 %v479_v47, %v483_v56 }
 0x45f   : > { %v485_v58 = vmul.f32 1.442695, %v484_v57 }
 0x460   : > { %v598_v59 = vpop.xlane.xlu0 %597  ;;  %v608_v63 = vpop.permute.xlu1 %607 }
 0x461   : > { %1440 = vpow2.f32 %v485_v58  ;;  %v599_v60 = vsub.f32 %v595_v54, %v598_v59  ;;  %v613_v3 = vsel %vm495_vm3, %v608_v63, 0  ;;  %v1436_v59 = vld [vmem:[#allocation7 + $0x10] sm:$0xff]  }
 0x463   : > { %v600_v61 = vmul.f32 1.442695, %v599_v60 }
 0x464   : > { %v761_v9 = vpop.permute.xlu1 %760 }
 0x465   : > { %1442 = vpow2.f32 %v600_v61  ;;  %v766_v30 = vsel %vm431_vm2, %v761_v9, 0 }
 0x46b   : > { %v1441_v62 = vpop.eup %1440 }
 0x46c   : > { %v487_v1 = vsel %vm480_vm5, %v1441_v62, 0.0  ;;  %v490_v2 = vpack.c.bf16 %v1441_v62, %v1441_v62 }
 0x46d   : > { %488 = vadd.xlane.f32.xlu1 %v487_v1 }
 0x46e   : > { %1278 = vmatmul.mubr.msk.bf16.vlgmr.msra.gmra.mrb[4].mxu1 %vm480_vm5, %v490_v2 }
 0x46f   : > { %v1443_v4 = vpop.eup %1442  ;;  %1288 = vmatpush3.bf16.msra.mxu1 %v613_v3  ;;  %1289 = vmatprep.mubr.msk.bf16.mxu1 %vm1623_vm1, %v1622_v26 }
 0x470   : > { %v602_v5 = vsel %vm480_vm5, %v1443_v4, 0.0  ;;  %1299 = vmatprep.subr.bf16.mxu1 %v1622_v26  ;;  %v605_v6 = vpack.c.bf16 %v1443_v4, %v1443_v4 }
 0x471   : > { %603 = vadd.xlane.f32.xlu0 %v602_v5 }
 0x476   : > { %1290 = vmatmul.mubr.msk.bf16.vlgmr.msra.gmra.mrb[8].mxu1 %vm480_vm5, %v605_v6 }
 0x477   : > { %1301 = vmatprep.mubr.msk.bf16.mxu1 %vm1623_vm1, %v1622_v26  ;;  %1300 = vmatpush3.bf16.msra.mxu1 %v1434_v7 }
 0x478   : > { %1311 = vmatprep.subr.bf16.mxu1 %v1622_v26 }
 0x47e   : > { %820 = vrot.lane.b32.xlu1 %v1877_v35, %s1628_s15 }
 0x482   : > { %923 = vrot.lane.b32.xlu1 %v1869_v28, %s1629_s7 }
 0x487   : > { %758 = vrot.lane.b32.xlu0 %v1869_v28, %s1628_s15  ;;  %s1548_s15 = scalar_lea.vmem %s1547_s8, 256 }
 0x488   : > { %p1550_p9 = scmp.lt.s32.totalorder %s1548_s15, %s1542_s14 }
 0x48a   : > { %p1551_p12 = por %p1550_p9, %p1549_p5 }
 0x48c   : > { %p1552_p2 = pnand %p1551_p12, %p1545_p3 }
 0x4fa   : > { %v489_v10 = vpop.xlane.xlu1 %488 }
 0x4fb   : > { %1444 = vrcp.f32 %v489_v10 }
 0x4fe   : > { %v604_v11 = vpop.xlane.xlu0 %603  ;;  %v821_v16 = vpop.permute.xlu1 %820 }
 0x4ff   : > { %1446 = vrcp.f32 %v604_v11  ;;  %v826_v20 = vsel %vm495_vm3, %v821_v16, 0 }
 0x502   : > { %v759_v31 = vpop.permute.xlu0 %758 }
 0x505   : > { %v1445_v12 = vpop.eup %1444 }
 0x509   : > { %v1447_v21 = vpop.eup %1446 }
 0x541   : > { %v533_v13 = vpop.f32.mrb[4].mxu1 }
 0x542   : > { %v540_v14 = vmul.f32 %v1445_v12, %v533_v13  ;;  %v1279_v15 = vpop.f32.mrb[5].mxu1 }
 0x543   : > { %v536_v17 = vpop.f32.mrb[6].mxu1 }
 0x544   : > { %v543_v18 = vpack.c.bf16 %v540_v14, %v540_v14  ;;  %v1280_v19 = vpop.f32.mrb[7].mxu1 }
 0x546   : > { %1302 = vmatmul.mubr.msk.bf16.vlgmr.msra.gmra.mrb[12].mxu1 %vm431_vm2, %v543_v18  ;;  %v1437_v18 = vld [vmem:[#allocation7 + $0x18] sm:$0xff]  }
 0x547   : > { %1312 = vmatpush3.bf16.msra.mxu1 %v826_v20  ;;  %1313 = vmatprep.mubr.msk.bf16.mxu1 %vm1623_vm1, %v1622_v26 }
 0x548   : > { %1323 = vmatprep.subr.bf16.mxu1 %v1622_v26 }
 0x549   : > { %v649_v22 = vpop.f32.mrb[8].mxu1 }
 0x54a   : > { %v656_v23 = vmul.f32 %v1447_v21, %v649_v22  ;;  %v1291_v24 = vpop.f32.mrb[9].mxu1 }
 0x54b   : > { %v652_v25 = vpop.f32.mrb[10].mxu1 }
 0x54c   : > { %v659_v27 = vpack.c.bf16 %v656_v23, %v656_v23  ;;  %v1292_v29 = vpop.f32.mrb[11].mxu1 }
 0x54e   : > { %1296 = vmatmul.mubr.msk.bf16.vlgmr.msra.gmra.mrb[8].mxu0 %vm431_vm2, %v659_v27 }
 0x54f   : > { %1306 = vmatpush3.bf16.xpose.msra.mxu0 %v766_v30  ;;  %1307 = vmatprep.mubr.msk.bf16.mxu0 %vm1623_vm1, %v1622_v26 }
 0x550   : > { %1317 = vmatprep.subr.bf16.mxu0 %v1622_v26 }
 0x556   : > { %1308 = vmatmul.mubr.msk.bf16.vlgmr.msra.gmra.mrb[12].mxu0 %vm431_vm2, %v759_v31 }
 0x557   : > { %1319 = vmatprep.mubr.msk.bf16.mxu0 %vm1623_vm1, %v1622_v26  ;;  %1318 = vmatpush3.bf16.msra.mxu0 %v1436_v59 }
 0x558   : > { %1329 = vmatprep.subr.bf16.mxu0 %v1622_v26 }
 0x619   : > { %v752_v32 = vpop.f32.mrb[12].mxu1 }
 0x61a   : > { %v1303_v33 = vpop.f32.mrb[13].mxu1 }
 0x61b   : > { %v755_v34 = vpop.f32.mrb[14].mxu1  ;;  %v1240_v33 = vld [vmem:[%s2028_s5] ss:$0 sm:$0xff] }
 0x61c   : > { %v1304_v36 = vpop.f32.mrb[15].mxu1 }
 0x621   : > { %v703_v37 = vpop.f32.mrb[8].mxu0 }
 0x622   : > { %v1937_v38 = vadd.f32 %v752_v32, %v703_v37  ;;  %v1297_v39 = vpop.f32.mrb[9].mxu0 }
 0x623   : > { %v706_v42 = vpop.f32.mrb[10].mxu0 }
 0x624   : > { %v1298_v43 = vpop.f32.mrb[11].mxu0 }
 0x629   : > { %v802_v44 = vpop.f32.mrb[12].mxu0 }
 0x62a   : > { %v808_v45 = vmul.f32 0.25, %v802_v44  ;;  %v1309_v46 = vpop.f32.mrb[13].mxu0 }
 0x62b   : > { %v805_v47 = vpop.f32.mrb[14].mxu0 }
 0x62c   : > { %v1310_v48 = vpop.f32.mrb[15].mxu0  ;;  %v809_v49 = vsel %vm426_vm4, %v808_v45, -1e+30 }
 0x62d   : > { %v810_v50 = vsel %vm480_vm5, %v809_v49, -inf }
 0x62e   : > { %811 = vmax.xlane.f32.xlu0 %v810_v50 }
 0x644   : > { %925 = vrot.lane.b32.xlu0 %v1869_v28, %s1630_s30  ;;  %v924_v28 = vpop.permute.xlu1 %923 }
 0x6bb   : > { %v812_v51 = vpop.xlane.xlu0 %811 }
 0x6bc   : > { %v813_v52 = vsub.f32 %v809_v49, %v812_v51 }
 0x6be   : > { %v814_v53 = vmul.f32 1.442695, %v813_v52 }
 0x6bf   : > { %v926_v55 = vpop.permute.xlu0 %925 }
 0x6c0   : > { %1448 = vpow2.f32 %v814_v53  ;;  %v931_v58 = vsel %vm431_vm2, %v926_v55, 0 }
 0x6ca   : > { %v1449_v54 = vpop.eup %1448 }
 0x6cb   : > { %v816_v56 = vsel %vm480_vm5, %v1449_v54, 0.0  ;;  %v819_v57 = vpack.c.bf16 %v1449_v54, %v1449_v54 }
 0x6cc   : > { %817 = vadd.xlane.f32.xlu1 %v816_v56 }
 0x6cd   : > { %1314 = vmatmul.mubr.msk.bf16.vlgmr.msra.gmra.mrb[16].mxu1 %vm480_vm5, %v819_v57 }
 0x6ce   : > { %1324 = vmatpush3.bf16.xpose.msra.mxu1 %v931_v58  ;;  %1325 = vmatprep.mubr.msk.bf16.mxu1 %vm1623_vm1, %v1622_v26 }
 0x6cf   : > { %1335 = vmatprep.subr.bf16.mxu1 %v1622_v26 }
 0x6d5   : > { %1326 = vmatmul.mubr.msk.bf16.vlgmr.msra.gmra.mrb[20].mxu1 %vm431_vm2, %v924_v28 }
 0x6d6   : > { %1337 = vmatprep.mubr.msk.bf16.mxu1 %vm1623_vm1, %v1622_v26  ;;  %1336 = vmatpush3.bf16.msra.mxu1 %v1437_v18 }
 0x6dd   : > { %985 = vrot.lane.b32.xlu1 %v1877_v35, %s1629_s7 }
 0x759   : > { %v818_v60 = vpop.xlane.xlu1 %817 }
 0x75a   : > { %1450 = vrcp.f32 %v818_v60 }
 0x75d   : > { %v986_v2 = vpop.permute.xlu1 %985 }
 0x75e   : > { %v991_v6 = vsel %vm495_vm3, %v986_v2, 0 }
 0x764   : > { %v1451_v61 = vpop.eup %1450 }
 0x7a0   : > { %v862_v62 = vpop.f32.mrb[16].mxu1 }
 0x7a1   : > { %v869_v63 = vmul.f32 %v1451_v61, %v862_v62  ;;  %v1315_v1 = vpop.f32.mrb[17].mxu1 }
 0x7a2   : > { %v865_v3 = vpop.f32.mrb[18].mxu1 }
 0x7a3   : > { %v872_v4 = vpack.c.bf16 %v869_v63, %v869_v63  ;;  %v1316_v5 = vpop.f32.mrb[19].mxu1 }
 0x7a5   : > { %1320 = vmatmul.mubr.msk.bf16.vlgmr.msra.gmra.mrb[16].mxu0 %vm431_vm2, %v872_v4 }
 0x7a6   : > { %1330 = vmatpush3.bf16.msra.mxu0 %v991_v6  ;;  %1331 = vmatprep.mubr.msk.bf16.mxu0 %vm1623_vm1, %v1622_v26 }
 0x7a8   : > { %v967_v35 = vpop.f32.mrb[20].mxu1 }
 0x7a9   : > { %v973_v7 = vmul.f32 0.25, %v967_v35  ;;  %v1327_v8 = vpop.f32.mrb[21].mxu1 }
 0x7aa   : > { %v970_v9 = vpop.f32.mrb[22].mxu1 }
 0x7ab   : > { %v1328_v10 = vpop.f32.mrb[23].mxu1  ;;  %v974_v11 = vsel %vm426_vm4, %v973_v7, -1e+30 }
 0x7ac   : > { %v975_v12 = vsel %vm480_vm5, %v974_v11, -inf }
 0x7ad   : > { %976 = vmax.xlane.f32.xlu0 %v975_v12 }
 0x83a   : > { %v977_v13 = vpop.xlane.xlu0 %976 }
 0x83b   : > { %v978_v14 = vsub.f32 %v974_v11, %v977_v13 }
 0x83d   : > { %v979_v15 = vmul.f32 1.442695, %v978_v14 }
 0x83f   : > { %1452 = vpow2.f32 %v979_v15 }
 0x849   : > { %v1453_v16 = vpop.eup %1452 }
 0x84a   : > { %v981_v17 = vsel %vm480_vm5, %v1453_v16, 0.0  ;;  %v984_v26 = vpack.c.bf16 %v1453_v16, %v1453_v16 }
 0x84b   : > { %982 = vadd.xlane.f32.xlu0 %v981_v17 }
 0x84c   : > { %1332 = vmatmul.mubr.msk.bf16.vlgmr.msra.gmra.mrb[20].mxu0 %vm480_vm5, %v984_v26 }
 0x878   : > { %v916_v19 = vpop.f32.mrb[16].mxu0 }
 0x879   : > { %v922_v40 = vadd.f32 %v916_v19, %v1937_v38  ;;  %v1321_v41 = vpop.f32.mrb[17].mxu0 }
 0x87a   : > { %v919_v20 = vpop.f32.mrb[18].mxu0 }
 0x87b   : > { %v1322_v21 = vpop.f32.mrb[19].mxu0 }
 0x8d8   : > { %v983_v22 = vpop.xlane.xlu0 %982 }
 0x8d9   : > { %1454 = vrcp.f32 %v983_v22 }
 0x8e3   : > { %v1455_v23 = vpop.eup %1454 }
 0x91f   : > { %v1027_v24 = vpop.f32.mrb[20].mxu0 }
 0x920   : > { %v1034_v25 = vmul.f32 %v1455_v23, %v1027_v24  ;;  %v1333_v27 = vpop.f32.mrb[21].mxu0 }
 0x921   : > { %v1030_v29 = vpop.f32.mrb[22].mxu0 }
 0x922   : > { %v1037_v30 = vpack.c.bf16 %v1034_v25, %v1034_v25  ;;  %v1334_v31 = vpop.f32.mrb[23].mxu0 }
 0x924   : > { %1338 = vmatmul.mubr.msk.bf16.vlgmr.msra.gmra.mrb[24].mxu1 %vm431_vm2, %v1037_v30 }
 0x9f7   : > { %v1081_v32 = vpop.f32.mrb[24].mxu1 }
 0x9f8   : > { %v1087_v34 = vadd.f32 %v1081_v32, %v922_v40  ;;  %v1339_v36 = vpop.f32.mrb[25].mxu1 }
 0x9f9   : > { %v1084_v37 = vpop.f32.mrb[26].mxu1 }
 0x9fa   : > { %v1095_v38 = vadd.f32 %v1240_v33, %v1087_v34  ;;  %v1340_v39 = vpop.f32.mrb[27].mxu1 }
 0x9fc   : > { %v1096_v42 = vadd.f32 %v1095_v38, %v1850_v0 }
 0x9fe   : > { %1097 = vst.msk [vmem:[%s295_s29] sm:$0xff] %vm300_vm0, %v1096_v42 }
 0x9ff   : > { %1555 = shalt.err (!%p1552_p2)
}
 0xa00   : > { %s1556_s20 = scalar_lea.hbm %s1978_s19, 128  ;;  %s1560_s13 = scalar_lea.hbm %s2029_s6, 256 }
 0xa01   : > { %p1557_p13 = scmp.ne.s32.totalorder %s1978_s19, %s1556_s20  ;;  %p1561_p4 = scmp.lt.u32.totalorder %s1978_s19, %s2029_s6 }
 0xa02   : > { %p1562_p7 = scmp.lt.u32.totalorder %s1560_s13, %s1556_s20  ;;  %p1564_p11 = scmp.lt.u32.totalorder %s1556_s20, %s1978_s19 }
 0xa03   : > { %p1558_p6 = pnand %p1557_p13, %p2043_p0 }
 0xa04   : > { %p1563_p8 = por %p1562_p7, %p1561_p4 }
 0xa05   : > { %p1559_p10 = pneg %p1558_p6 }
 0xa06   : > { %p1565_p1 = por %p1564_p11, %p1563_p8 }
 0xa08   : > { %p1566_p3 = pnand %p1565_p1, %p1559_p10 }
 0xa0a   : > { %1569 = shalt.err (!%p1566_p3)
}
 0xa0b   : > { %1351 = dma.vmem_to_hbm [thread:$0]  (%p2043_p0), %s1980_s16, 128, %s1978_s19, %s1099_s25  }
 0xa0c PF: > { %s1124_s29 = sand.u32 1, %s1600_s21   ;;  %p2044_p5 = scmp.ne.s32.totalorder %s2034_s28, 0 }
 0xa0d   : > { %p2045_p9 = scmp.ge.s32.totalorder %s1612_s24, 2  ;;  %s1125_s17 = scalar_lea.sflag [#allocation4], %s1124_s29 }
 0xa0f   : > { %p1365_p12 = pnand %p2045_p9, %p2044_p5 }
 0xa11   : > { %1595 = dma.done.wait (!%p1365_p12), %s1125_s17, 128  }
 0xa12   : > { %1597 = vsyncadd (!%p1365_p12), %s1125_s17, 4294967168  ;;  %p20_p2 = scmp.ge.s32.totalorder %s1777_s26, 4   ;;  %s2046_s21 = smov %s1604_s22 }
 0xa13   : > { %s2047_s22 = smov %s1608_s23  ;;  %s2048_s23 = smov %s1786_s11 }
 0xa14   : > { %s2049_s24 = smov %s1777_s26  ;;  %22 = sbr.rel (!%p20_p2) target bundleno = 6 (0x6), region = 97 }
 0xa1b   :  { %1130 = vsyncpa [#allocation3], 1 }
 0xa1c   :  { %1132 = vsyncpa [#allocation3 + $0x1], 1 }
 0xa1d   :  { %1133 = vsyncpa [#allocation6], 1 }
 0xa1e   :  { %1134 = vsyncpa [#allocation4], 1 }
 0xa1f   :  { %1136 = vsyncpa [#allocation4 + $0x1], 1 }

</bundles_post_ra>
